<compile_context>
chip_gen: v6e
topology: v6e:2x2x1
jax: 0.10.0
libtpu: 0.0.40
codegen_flags: <defaults>
</compile_context>

<pallas_src>
import functools
import math

import jax
import jax.numpy as jnp
from jax import lax
from jax.experimental import pallas as pl
from jax.experimental.pallas import tpu as pltpu  # noqa: F401  (kept for TPU-specific tuning hooks)

D_MODEL = 32
NHEAD = 4
DIM_FF = 64
SEQ = 8
BATCH = 2
HEAD_DIM = D_MODEL // NHEAD
LN_EPS = 1e-5
NEG_INF = -1e30


def _layer_norm(x, gamma, beta):
    mu = jnp.mean(x, axis=-1, keepdims=True)
    var = jnp.mean((x - mu) ** 2, axis=-1, keepdims=True)
    return (x - mu) * lax.rsqrt(var + LN_EPS) * gamma + beta


def _sa_kernel(x_ref, pos_ref, w64_ref, w32_ref, vec64_ref, vec32_ref, o_ref,
               *, batch, nhead, d_ff):
    n, dm = x_ref.shape                  # (S*B, D), rows are seq-major with batch innermost
    hd = dm // nhead
    scale = 1.0 / math.sqrt(hd)

    x = x_ref[...]                       # (N, D) residual stream / attention value input
    xp = x + pos_ref[...]                # src + pos -> query & key input

    # Static slices of the packed weight slabs (weights pre-transposed: y = x @ W + b).
    wqk = w64_ref[0:dm, :]               # (D, 2D)  [Wq | Wk]
    w1 = w64_ref[dm:2 * dm, :]           # (D, F)
    wv = w32_ref[0:dm, :]                # (D, D)
    wo = w32_ref[dm:2 * dm, :]           # (D, D)
    w2 = w32_ref[2 * dm:2 * dm + d_ff, :]  # (F, D)
    bqk = vec64_ref[0:1, :]              # (1, 2D)  [bq | bk]
    b1 = vec64_ref[1:2, :]               # (1, F)
    bv = vec32_ref[0:1, :]
    bo = vec32_ref[1:2, :]
    b2 = vec32_ref[2:3, :]
    g11 = vec32_ref[3:4, :]
    be11 = vec32_ref[4:5, :]
    g13 = vec32_ref[5:6, :]
    be13 = vec32_ref[6:7, :]

    # Fused Q|K projection (one MXU push) + V projection.
    qk = jnp.dot(xp, wqk, preferred_element_type=jnp.float32) + bqk      # (N, 2D)
    v = jnp.dot(x, wv, preferred_element_type=jnp.float32) + bv          # (N, D)
    q = qk[:, 0:dm]
    k = qk[:, dm:2 * dm]

    # Rows interleave batches (row % batch == batch id); mask cross-batch score entries.
    ri = lax.broadcasted_iota(jnp.int32, (n, n), 0)
    ci = lax.broadcasted_iota(jnp.int32, (n, n), 1)
    batch_bias = jnp.where((ri % batch) == (ci % batch), 0.0, NEG_INF)   # (N, N)

    lane = lax.broadcasted_iota(jnp.int32, (1, dm), 1)                   # (1, D)
    dn = (((1,), (1,)), ((), ()))  # contract last dims of both operands (no explicit k.T)

    attn = jnp.zeros((n, dm), jnp.float32)
    for h in range(nhead):
        in_h = (lane >= h * hd) & (lane < (h + 1) * hd)                  # head lane mask
        # Zeroing non-head lanes of q restricts the contraction to this head's dims;
        # the 1/sqrt(hd) scale is folded into the mask constant.
        s = lax.dot_general(q * jnp.where(in_h, scale, 0.0), k, dn,
                            preferred_element_type=jnp.float32)          # (N, N)
        s = s + batch_bias
        s = s - jnp.max(s, axis=-1, keepdims=True)
        p = jnp.exp(s)                                                   # masked entries -> 0
        p = p * pl.reciprocal(jnp.sum(p, axis=-1, keepdims=True), approx=True)
        oh = jnp.dot(p, v, preferred_element_type=jnp.float32)           # (N, D)
        attn = attn + jnp.where(in_h, oh, 0.0)                           # keep head-h lanes

    attn = jnp.dot(attn, wo, preferred_element_type=jnp.float32) + bo

    # residual + norm11 (dropout11 identity in eval)
    y = _layer_norm(x + attn, g11, be11)
    # feed-forward: linear12(relu(linear11(y)))  (dropout1 identity)
    hdn = jnp.maximum(jnp.dot(y, w1, preferred_element_type=jnp.float32) + b1, 0.0)
    ff = jnp.dot(hdn, w2, preferred_element_type=jnp.float32) + b2
    # residual + norm13 (dropout13 identity)
    z = _layer_norm(y + ff, g13, be13)

    o_ref[...] = z.astype(o_ref.dtype)


def pack_params(p):
    """Pack the 16 SA parameters into 4 contiguous slabs (done once, outside the forward path).

    Packing relies on 2*D_MODEL == DIM_FF (true for this module config: 64 == 64).
    """
    wqk = jnp.concatenate([p["wq"], p["wk"]], axis=1)                    # (D, 2D)
    w64 = jnp.concatenate([wqk, p["w1"]], axis=0)                        # (2D, 2D)
    w32 = jnp.concatenate([p["wv"], p["wo"], p["w2"]], axis=0)           # (2D+F, D)
    bqk = jnp.concatenate([p["bq"], p["bk"]], axis=1)                    # (1, 2D)
    vec64 = jnp.concatenate([bqk, p["b1"]], axis=0)                      # (2, 2D)
    vec32 = jnp.concatenate(
        [p["bv"], p["bo"], p["b2"], p["g11"], p["be11"], p["g13"], p["be13"],
         jnp.zeros((1, p["bv"].shape[1]), p["bv"].dtype)], axis=0)       # (8, D)
    return {"w64": w64, "w32": w32, "vec64": vec64, "vec32": vec32}


def sa_forward(src, packed, pos=None):
    """src, pos: (S, B, D) seq-first (PyTorch MHA convention). Returns (S, B, D)."""
    S, B, D = src.shape
    x = src.reshape(S * B, D)                 # contiguous reshape: no transpose, no data movement
    pos2 = jnp.zeros_like(x) if pos is None else pos.reshape(S * B, D)
    kernel = functools.partial(_sa_kernel, batch=B, nhead=NHEAD, d_ff=DIM_FF)
    out = pl.pallas_call(
        kernel,
        out_shape=jax.ShapeDtypeStruct((S * B, D), src.dtype),
    )(x, pos2, packed["w64"], packed["w32"], packed["vec64"], packed["vec32"])
    return out.reshape(S, B, D)


def sa_reference(src, params, pos=None):
    """Pure-JAX reference, same math as the kernel (for correctness check)."""
    x = jnp.transpose(src, (1, 0, 2))
    xp = x if pos is None else x + jnp.transpose(pos, (1, 0, 2))
    B, S, D = x.shape
    p = params
    q = (xp @ p["wq"] + p["bq"]).reshape(B, S, NHEAD, HEAD_DIM)
    k = (xp @ p["wk"] + p["bk"]).reshape(B, S, NHEAD, HEAD_DIM)
    v = (x @ p["wv"] + p["bv"]).reshape(B, S, NHEAD, HEAD_DIM)
    s = jnp.einsum('bqhd,bkhd->bhqk', q, k) / math.sqrt(HEAD_DIM)
    a = jax.nn.softmax(s, axis=-1)
    o = jnp.einsum('bhqk,bkhd->bqhd', a, v).reshape(B, S, D)
    o = o @ p["wo"] + p["bo"]
    y = _layer_norm(x + o, p["g11"], p["be11"])
    ff = jnp.maximum(y @ p["w1"] + p["b1"], 0.0) @ p["w2"] + p["b2"]
    z = _layer_norm(y + ff, p["g13"], p["be13"])
    return jnp.transpose(z, (1, 0, 2))


def init_params(key):
    ks = jax.random.split(key, 12)

    def w(k, shape, scale=0.05):
        return (scale * jax.random.normal(k, shape)).astype(jnp.float32)

    return {
        # MultiheadAttention in_proj (split into q/k/v), weights pre-transposed
        "wq": w(ks[0], (D_MODEL, D_MODEL)), "bq": w(ks[1], (1, D_MODEL)),
        "wk": w(ks[2], (D_MODEL, D_MODEL)), "bk": w(ks[3], (1, D_MODEL)),
        "wv": w(ks[4], (D_MODEL, D_MODEL)), "bv": w(ks[5], (1, D_MODEL)),
        # out_proj
        "wo": w(ks[6], (D_MODEL, D_MODEL)), "bo": w(ks[7], (1, D_MODEL)),
        # norm11
        "g11": jnp.ones((1, D_MODEL), jnp.float32),
        "be11": jnp.zeros((1, D_MODEL), jnp.float32),
        # linear11 / linear12 (pre-transposed)
        "w1": w(ks[8], (D_MODEL, DIM_FF)), "b1": w(ks[9], (1, DIM_FF)),
        "w2": w(ks[10], (DIM_FF, D_MODEL)), "b2": w(ks[11], (1, D_MODEL)),
        # norm13
        "g13": jnp.ones((1, D_MODEL), jnp.float32),
        "be13": jnp.zeros((1, D_MODEL), jnp.float32),
    }


if __name__ == "__main__":
    key = jax.random.PRNGKey(0)
    k_src, k_pos, k_par = jax.random.split(key, 3)

    src1 = jax.random.normal(k_src, (SEQ, BATCH, D_MODEL), jnp.float32)
    pos_src1 = jax.random.normal(k_pos, (SEQ, BATCH, D_MODEL), jnp.float32)
    params = init_params(k_par)
    packed = pack_params(params)      # one-time weight packing (outside the per-call path)

    out = jax.block_until_ready(sa_forward(src1, packed, pos=pos_src1))
    ref = jax.block_until_ready(sa_reference(src1, params, pos=pos_src1))

    assert out.shape == (SEQ, BATCH, D_MODEL)
    max_err = float(jnp.max(jnp.abs(out - ref)))
    # tolerance loosened slightly vs 1e-4 because the softmax uses the EUP approx reciprocal
    assert max_err < 5e-3, f"kernel mismatch vs reference (max abs err {max_err})"

    print("KERNEL_OK")
</pallas_src>

<mosaic_0001>
module attributes {stable_mosaic.version = 11 : i64} {
  func.func @_sa_kernel(%arg0: memref<16x32xf32, #tpu.memory_space<vmem>>, %arg1: memref<16x32xf32, #tpu.memory_space<vmem>>, %arg2: memref<64x64xf32, #tpu.memory_space<vmem>>, %arg3: memref<128x32xf32, #tpu.memory_space<vmem>>, %arg4: memref<2x64xf32, #tpu.memory_space<vmem>>, %arg5: memref<8x32xf32, #tpu.memory_space<vmem>>, %arg6: memref<16x32xf32, #tpu.memory_space<vmem>>) attributes {dimension_semantics = [], scalar_prefetch = 0 : i64, scratch_operands = 0 : i64, tpu.core_type = #tpu.core_type<tc>} {
    %c0 = arith.constant 0 : index
    %c0_0 = arith.constant 0 : index
    %0 = vector.load %arg0[%c0, %c0_0] : memref<16x32xf32, #tpu.memory_space<vmem>>, vector<16x32xf32>
    %c0_1 = arith.constant 0 : index
    %c0_2 = arith.constant 0 : index
    %1 = vector.load %arg1[%c0_1, %c0_2] : memref<16x32xf32, #tpu.memory_space<vmem>>, vector<16x32xf32>
    %2 = arith.addf %0, %1 : vector<16x32xf32>
    %c0_3 = arith.constant 0 : index
    %c0_4 = arith.constant 0 : index
    %3 = vector.load %arg2[%c0_3, %c0_4] : memref<64x64xf32, #tpu.memory_space<vmem>>, vector<32x64xf32>
    %c32 = arith.constant 32 : index
    %c0_5 = arith.constant 0 : index
    %4 = vector.load %arg2[%c32, %c0_5] : memref<64x64xf32, #tpu.memory_space<vmem>>, vector<32x64xf32>
    %c0_6 = arith.constant 0 : index
    %c0_7 = arith.constant 0 : index
    %5 = vector.load %arg3[%c0_6, %c0_7] : memref<128x32xf32, #tpu.memory_space<vmem>>, vector<32x32xf32>
    %c32_8 = arith.constant 32 : index
    %c0_9 = arith.constant 0 : index
    %6 = vector.load %arg3[%c32_8, %c0_9] : memref<128x32xf32, #tpu.memory_space<vmem>>, vector<32x32xf32>
    %c64 = arith.constant 64 : index
    %c0_10 = arith.constant 0 : index
    %7 = vector.load %arg3[%c64, %c0_10] : memref<128x32xf32, #tpu.memory_space<vmem>>, vector<64x32xf32>
    %c0_11 = arith.constant 0 : index
    %c0_12 = arith.constant 0 : index
    %8 = vector.load %arg4[%c0_11, %c0_12] : memref<2x64xf32, #tpu.memory_space<vmem>>, vector<1x64xf32>
    %c1 = arith.constant 1 : index
    %c0_13 = arith.constant 0 : index
    %9 = vector.load %arg4[%c1, %c0_13] : memref<2x64xf32, #tpu.memory_space<vmem>>, vector<1x64xf32>
    %c0_14 = arith.constant 0 : index
    %c0_15 = arith.constant 0 : index
    %10 = vector.load %arg5[%c0_14, %c0_15] : memref<8x32xf32, #tpu.memory_space<vmem>>, vector<1x32xf32>
    %c1_16 = arith.constant 1 : index
    %c0_17 = arith.constant 0 : index
    %11 = vector.load %arg5[%c1_16, %c0_17] : memref<8x32xf32, #tpu.memory_space<vmem>>, vector<1x32xf32>
    %c2 = arith.constant 2 : index
    %c0_18 = arith.constant 0 : index
    %12 = vector.load %arg5[%c2, %c0_18] : memref<8x32xf32, #tpu.memory_space<vmem>>, vector<1x32xf32>
    %c3 = arith.constant 3 : index
    %c0_19 = arith.constant 0 : index
    %13 = vector.load %arg5[%c3, %c0_19] : memref<8x32xf32, #tpu.memory_space<vmem>>, vector<1x32xf32>
    %c4 = arith.constant 4 : index
    %c0_20 = arith.constant 0 : index
    %14 = vector.load %arg5[%c4, %c0_20] : memref<8x32xf32, #tpu.memory_space<vmem>>, vector<1x32xf32>
    %c5 = arith.constant 5 : index
    %c0_21 = arith.constant 0 : index
    %15 = vector.load %arg5[%c5, %c0_21] : memref<8x32xf32, #tpu.memory_space<vmem>>, vector<1x32xf32>
    %c6 = arith.constant 6 : index
    %c0_22 = arith.constant 0 : index
    %16 = vector.load %arg5[%c6, %c0_22] : memref<8x32xf32, #tpu.memory_space<vmem>>, vector<1x32xf32>
    %cst = arith.constant dense<0.000000e+00> : vector<16x64xf32>
    %17 = tpu.matmul %2, %3, %cst {dimension_numbers = #tpu.dot_dimension_numbers<[1], [0], [0], [1], [0, 0, 1, 1], [], []>} : vector<16x32xf32>, vector<32x64xf32>, vector<16x64xf32> -> vector<16x64xf32>
    %18 = vector.broadcast %8 : vector<1x64xf32> to vector<16x64xf32>
    %19 = arith.addf %17, %18 : vector<16x64xf32>
    %cst_23 = arith.constant dense<0.000000e+00> : vector<16x32xf32>
    %20 = tpu.matmul %0, %5, %cst_23 {dimension_numbers = #tpu.dot_dimension_numbers<[1], [0], [0], [1], [0, 0, 1, 1], [], []>} : vector<16x32xf32>, vector<32x32xf32>, vector<16x32xf32> -> vector<16x32xf32>
    %21 = vector.broadcast %10 : vector<1x32xf32> to vector<16x32xf32>
    %22 = arith.addf %20, %21 : vector<16x32xf32>
    %23 = vector.extract_strided_slice %19 {offsets = [0, 0], sizes = [16, 32], strides = [1, 1]} : vector<16x64xf32> to vector<16x32xf32>
    %24 = vector.extract_strided_slice %19 {offsets = [0, 32], sizes = [16, 32], strides = [1, 1]} : vector<16x64xf32> to vector<16x32xf32>
    %25 = tpu.iota {dimensions = array<i32: 0>} : vector<16x16xi32>
    %26 = tpu.iota {dimensions = array<i32: 1>} : vector<16x16xi32>
    %c2_i32 = arith.constant 2 : i32
    %c0_i32 = arith.constant 0 : i32
    %27 = arith.cmpi eq, %c2_i32, %c0_i32 : i32
    %c1_i32 = arith.constant 1 : i32
    %28 = arith.select %27, %c1_i32, %c2_i32 : i32
    %29 = vector.broadcast %28 : i32 to vector<16x16xi32>
    %30 = arith.remsi %25, %29 : vector<16x16xi32>
    %c0_i32_24 = arith.constant 0 : i32
    %31 = vector.broadcast %c0_i32_24 : i32 to vector<16x16xi32>
    %32 = arith.cmpi ne, %30, %31 : vector<16x16xi32>
    %c0_i32_25 = arith.constant 0 : i32
    %33 = vector.broadcast %c0_i32_25 : i32 to vector<16x16xi32>
    %34 = arith.cmpi slt, %30, %33 : vector<16x16xi32>
    %c0_i32_26 = arith.constant 0 : i32
    %35 = arith.cmpi slt, %28, %c0_i32_26 : i32
    %36 = vector.broadcast %35 : i1 to vector<16x16xi1>
    %37 = vector.broadcast %36 : vector<16x16xi1> to vector<16x16xi1>
    %38 = arith.xori %34, %37 : vector<16x16xi1>
    %39 = arith.andi %38, %32 : vector<16x16xi1>
    %40 = vector.broadcast %28 : i32 to vector<16x16xi32>
    %41 = arith.addi %30, %40 : vector<16x16xi32>
    %42 = arith.select %39, %41, %30 : vector<16x16xi1>, vector<16x16xi32>
    %c2_i32_27 = arith.constant 2 : i32
    %c0_i32_28 = arith.constant 0 : i32
    %43 = arith.cmpi eq, %c2_i32_27, %c0_i32_28 : i32
    %c1_i32_29 = arith.constant 1 : i32
    %44 = arith.select %43, %c1_i32_29, %c2_i32_27 : i32
    %45 = vector.broadcast %44 : i32 to vector<16x16xi32>
    %46 = arith.remsi %26, %45 : vector<16x16xi32>
    %c0_i32_30 = arith.constant 0 : i32
    %47 = vector.broadcast %c0_i32_30 : i32 to vector<16x16xi32>
    %48 = arith.cmpi ne, %46, %47 : vector<16x16xi32>
    %c0_i32_31 = arith.constant 0 : i32
    %49 = vector.broadcast %c0_i32_31 : i32 to vector<16x16xi32>
    %50 = arith.cmpi slt, %46, %49 : vector<16x16xi32>
    %c0_i32_32 = arith.constant 0 : i32
    %51 = arith.cmpi slt, %44, %c0_i32_32 : i32
    %52 = vector.broadcast %51 : i1 to vector<16x16xi1>
    %53 = vector.broadcast %52 : vector<16x16xi1> to vector<16x16xi1>
    %54 = arith.xori %50, %53 : vector<16x16xi1>
    %55 = arith.andi %54, %48 : vector<16x16xi1>
    %56 = vector.broadcast %44 : i32 to vector<16x16xi32>
    %57 = arith.addi %46, %56 : vector<16x16xi32>
    %58 = arith.select %55, %57, %46 : vector<16x16xi1>, vector<16x16xi32>
    %59 = arith.cmpi eq, %42, %58 : vector<16x16xi32>
    %cst_33 = arith.constant 0.000000e+00 : f32
    %cst_34 = arith.constant -1.000000e+30 : f32
    %60 = vector.broadcast %cst_33 : f32 to vector<16x16xf32>
    %61 = vector.broadcast %cst_34 : f32 to vector<16x16xf32>
    %62 = arith.select %59, %60, %61 : vector<16x16xi1>, vector<16x16xf32>
    %63 = tpu.iota {dimensions = array<i32: 1>} : vector<1x32xi32>
    %cst_35 = arith.constant 0.000000e+00 : f32
    %64 = vector.broadcast %cst_35 : f32 to vector<16x32xf32>
    %c0_i32_36 = arith.constant 0 : i32
    %65 = vector.broadcast %c0_i32_36 : i32 to vector<1x32xi32>
    %66 = arith.cmpi sge, %63, %65 : vector<1x32xi32>
    %c8_i32 = arith.constant 8 : i32
    %67 = vector.broadcast %c8_i32 : i32 to vector<1x32xi32>
    %68 = arith.cmpi slt, %63, %67 : vector<1x32xi32>
    %69 = arith.andi %66, %68 : vector<1x32xi1>
    %cst_37 = arith.constant 0.353553385 : f32
    %cst_38 = arith.constant 0.000000e+00 : f32
    %70 = vector.broadcast %cst_37 : f32 to vector<1x32xf32>
    %71 = vector.broadcast %cst_38 : f32 to vector<1x32xf32>
    %72 = arith.select %69, %70, %71 : vector<1x32xi1>, vector<1x32xf32>
    %73 = vector.broadcast %72 : vector<1x32xf32> to vector<16x32xf32>
    %74 = arith.mulf %23, %73 : vector<16x32xf32>
    %cst_39 = arith.constant dense<0.000000e+00> : vector<16x16xf32>
    %75 = tpu.matmul %74, %24, %cst_39 {dimension_numbers = #tpu.dot_dimension_numbers<[1], [1], [0], [0], [0, 0, 1, 0], [], []>} : vector<16x32xf32>, vector<16x32xf32>, vector<16x16xf32> -> vector<16x16xf32>
    %76 = arith.addf %75, %62 : vector<16x16xf32>
    %cst_40 = arith.constant dense<0xFF800000> : vector<16xf32>
    %77 = vector.multi_reduction <maximumf>, %76, %cst_40 [1] : vector<16x16xf32> to vector<16xf32>
    %78 = vector.shape_cast %77 : vector<16xf32> to vector<16x1xf32>
    %79 = vector.broadcast %78 : vector<16x1xf32> to vector<16x16xf32>
    %80 = arith.subf %76, %79 : vector<16x16xf32>
    %81 = math.exp %80 : vector<16x16xf32>
    %cst_41 = arith.constant dense<0.000000e+00> : vector<16xf32>
    %82 = vector.multi_reduction <add>, %81, %cst_41 [1] : vector<16x16xf32> to vector<16xf32>
    %83 = vector.shape_cast %82 : vector<16xf32> to vector<16x1xf32>
    %84 = tpu.reciprocal %83 {approx = true} : vector<16x1xf32> -> vector<16x1xf32>
    %85 = vector.broadcast %84 : vector<16x1xf32> to vector<16x16xf32>
    %86 = arith.mulf %81, %85 : vector<16x16xf32>
    %cst_42 = arith.constant dense<0.000000e+00> : vector<16x32xf32>
    %87 = tpu.matmul %86, %22, %cst_42 {dimension_numbers = #tpu.dot_dimension_numbers<[1], [0], [0], [1], [0, 0, 1, 1], [], []>} : vector<16x16xf32>, vector<16x32xf32>, vector<16x32xf32> -> vector<16x32xf32>
    %cst_43 = arith.constant 0.000000e+00 : f32
    %88 = vector.shape_cast %69 : vector<1x32xi1> to vector<1x32xi1>
    %89 = vector.broadcast %88 : vector<1x32xi1> to vector<16x32xi1>
    %90 = vector.broadcast %cst_43 : f32 to vector<16x32xf32>
    %91 = arith.select %89, %87, %90 : vector<16x32xi1>, vector<16x32xf32>
    %92 = arith.addf %64, %91 : vector<16x32xf32>
    %c8_i32_44 = arith.constant 8 : i32
    %93 = vector.broadcast %c8_i32_44 : i32 to vector<1x32xi32>
    %94 = arith.cmpi sge, %63, %93 : vector<1x32xi32>
    %c16_i32 = arith.constant 16 : i32
    %95 = vector.broadcast %c16_i32 : i32 to vector<1x32xi32>
    %96 = arith.cmpi slt, %63, %95 : vector<1x32xi32>
    %97 = arith.andi %94, %96 : vector<1x32xi1>
    %cst_45 = arith.constant 0.353553385 : f32
    %cst_46 = arith.constant 0.000000e+00 : f32
    %98 = vector.broadcast %cst_45 : f32 to vector<1x32xf32>
    %99 = vector.broadcast %cst_46 : f32 to vector<1x32xf32>
    %100 = arith.select %97, %98, %99 : vector<1x32xi1>, vector<1x32xf32>
    %101 = vector.broadcast %100 : vector<1x32xf32> to vector<16x32xf32>
    %102 = arith.mulf %23, %101 : vector<16x32xf32>
    %cst_47 = arith.constant dense<0.000000e+00> : vector<16x16xf32>
    %103 = tpu.matmul %102, %24, %cst_47 {dimension_numbers = #tpu.dot_dimension_numbers<[1], [1], [0], [0], [0, 0, 1, 0], [], []>} : vector<16x32xf32>, vector<16x32xf32>, vector<16x16xf32> -> vector<16x16xf32>
    %104 = arith.addf %103, %62 : vector<16x16xf32>
    %cst_48 = arith.constant dense<0xFF800000> : vector<16xf32>
    %105 = vector.multi_reduction <maximumf>, %104, %cst_48 [1] : vector<16x16xf32> to vector<16xf32>
    %106 = vector.shape_cast %105 : vector<16xf32> to vector<16x1xf32>
    %107 = vector.broadcast %106 : vector<16x1xf32> to vector<16x16xf32>
    %108 = arith.subf %104, %107 : vector<16x16xf32>
    %109 = math.exp %108 : vector<16x16xf32>
    %cst_49 = arith.constant dense<0.000000e+00> : vector<16xf32>
    %110 = vector.multi_reduction <add>, %109, %cst_49 [1] : vector<16x16xf32> to vector<16xf32>
    %111 = vector.shape_cast %110 : vector<16xf32> to vector<16x1xf32>
    %112 = tpu.reciprocal %111 {approx = true} : vector<16x1xf32> -> vector<16x1xf32>
    %113 = vector.broadcast %112 : vector<16x1xf32> to vector<16x16xf32>
    %114 = arith.mulf %109, %113 : vector<16x16xf32>
    %cst_50 = arith.constant dense<0.000000e+00> : vector<16x32xf32>
    %115 = tpu.matmul %114, %22, %cst_50 {dimension_numbers = #tpu.dot_dimension_numbers<[1], [0], [0], [1], [0, 0, 1, 1], [], []>} : vector<16x16xf32>, vector<16x32xf32>, vector<16x32xf32> -> vector<16x32xf32>
    %cst_51 = arith.constant 0.000000e+00 : f32
    %116 = vector.shape_cast %97 : vector<1x32xi1> to vector<1x32xi1>
    %117 = vector.broadcast %116 : vector<1x32xi1> to vector<16x32xi1>
    %118 = vector.broadcast %cst_51 : f32 to vector<16x32xf32>
    %119 = arith.select %117, %115, %118 : vector<16x32xi1>, vector<16x32xf32>
    %120 = arith.addf %92, %119 : vector<16x32xf32>
    %c16_i32_52 = arith.constant 16 : i32
    %121 = vector.broadcast %c16_i32_52 : i32 to vector<1x32xi32>
    %122 = arith.cmpi sge, %63, %121 : vector<1x32xi32>
    %c24_i32 = arith.constant 24 : i32
    %123 = vector.broadcast %c24_i32 : i32 to vector<1x32xi32>
    %124 = arith.cmpi slt, %63, %123 : vector<1x32xi32>
    %125 = arith.andi %122, %124 : vector<1x32xi1>
    %cst_53 = arith.constant 0.353553385 : f32
    %cst_54 = arith.constant 0.000000e+00 : f32
    %126 = vector.broadcast %cst_53 : f32 to vector<1x32xf32>
    %127 = vector.broadcast %cst_54 : f32 to vector<1x32xf32>
    %128 = arith.select %125, %126, %127 : vector<1x32xi1>, vector<1x32xf32>
    %129 = vector.broadcast %128 : vector<1x32xf32> to vector<16x32xf32>
    %130 = arith.mulf %23, %129 : vector<16x32xf32>
    %cst_55 = arith.constant dense<0.000000e+00> : vector<16x16xf32>
    %131 = tpu.matmul %130, %24, %cst_55 {dimension_numbers = #tpu.dot_dimension_numbers<[1], [1], [0], [0], [0, 0, 1, 0], [], []>} : vector<16x32xf32>, vector<16x32xf32>, vector<16x16xf32> -> vector<16x16xf32>
    %132 = arith.addf %131, %62 : vector<16x16xf32>
    %cst_56 = arith.constant dense<0xFF800000> : vector<16xf32>
    %133 = vector.multi_reduction <maximumf>, %132, %cst_56 [1] : vector<16x16xf32> to vector<16xf32>
    %134 = vector.shape_cast %133 : vector<16xf32> to vector<16x1xf32>
    %135 = vector.broadcast %134 : vector<16x1xf32> to vector<16x16xf32>
    %136 = arith.subf %132, %135 : vector<16x16xf32>
    %137 = math.exp %136 : vector<16x16xf32>
    %cst_57 = arith.constant dense<0.000000e+00> : vector<16xf32>
    %138 = vector.multi_reduction <add>, %137, %cst_57 [1] : vector<16x16xf32> to vector<16xf32>
    %139 = vector.shape_cast %138 : vector<16xf32> to vector<16x1xf32>
    %140 = tpu.reciprocal %139 {approx = true} : vector<16x1xf32> -> vector<16x1xf32>
    %141 = vector.broadcast %140 : vector<16x1xf32> to vector<16x16xf32>
    %142 = arith.mulf %137, %141 : vector<16x16xf32>
    %cst_58 = arith.constant dense<0.000000e+00> : vector<16x32xf32>
    %143 = tpu.matmul %142, %22, %cst_58 {dimension_numbers = #tpu.dot_dimension_numbers<[1], [0], [0], [1], [0, 0, 1, 1], [], []>} : vector<16x16xf32>, vector<16x32xf32>, vector<16x32xf32> -> vector<16x32xf32>
    %cst_59 = arith.constant 0.000000e+00 : f32
    %144 = vector.shape_cast %125 : vector<1x32xi1> to vector<1x32xi1>
    %145 = vector.broadcast %144 : vector<1x32xi1> to vector<16x32xi1>
    %146 = vector.broadcast %cst_59 : f32 to vector<16x32xf32>
    %147 = arith.select %145, %143, %146 : vector<16x32xi1>, vector<16x32xf32>
    %148 = arith.addf %120, %147 : vector<16x32xf32>
    %c24_i32_60 = arith.constant 24 : i32
    %149 = vector.broadcast %c24_i32_60 : i32 to vector<1x32xi32>
    %150 = arith.cmpi sge, %63, %149 : vector<1x32xi32>
    %c32_i32 = arith.constant 32 : i32
    %151 = vector.broadcast %c32_i32 : i32 to vector<1x32xi32>
    %152 = arith.cmpi slt, %63, %151 : vector<1x32xi32>
    %153 = arith.andi %150, %152 : vector<1x32xi1>
    %cst_61 = arith.constant 0.353553385 : f32
    %cst_62 = arith.constant 0.000000e+00 : f32
    %154 = vector.broadcast %cst_61 : f32 to vector<1x32xf32>
    %155 = vector.broadcast %cst_62 : f32 to vector<1x32xf32>
    %156 = arith.select %153, %154, %155 : vector<1x32xi1>, vector<1x32xf32>
    %157 = vector.broadcast %156 : vector<1x32xf32> to vector<16x32xf32>
    %158 = arith.mulf %23, %157 : vector<16x32xf32>
    %cst_63 = arith.constant dense<0.000000e+00> : vector<16x16xf32>
    %159 = tpu.matmul %158, %24, %cst_63 {dimension_numbers = #tpu.dot_dimension_numbers<[1], [1], [0], [0], [0, 0, 1, 0], [], []>} : vector<16x32xf32>, vector<16x32xf32>, vector<16x16xf32> -> vector<16x16xf32>
    %160 = arith.addf %159, %62 : vector<16x16xf32>
    %cst_64 = arith.constant dense<0xFF800000> : vector<16xf32>
    %161 = vector.multi_reduction <maximumf>, %160, %cst_64 [1] : vector<16x16xf32> to vector<16xf32>
    %162 = vector.shape_cast %161 : vector<16xf32> to vector<16x1xf32>
    %163 = vector.broadcast %162 : vector<16x1xf32> to vector<16x16xf32>
    %164 = arith.subf %160, %163 : vector<16x16xf32>
    %165 = math.exp %164 : vector<16x16xf32>
    %cst_65 = arith.constant dense<0.000000e+00> : vector<16xf32>
    %166 = vector.multi_reduction <add>, %165, %cst_65 [1] : vector<16x16xf32> to vector<16xf32>
    %167 = vector.shape_cast %166 : vector<16xf32> to vector<16x1xf32>
    %168 = tpu.reciprocal %167 {approx = true} : vector<16x1xf32> -> vector<16x1xf32>
    %169 = vector.broadcast %168 : vector<16x1xf32> to vector<16x16xf32>
    %170 = arith.mulf %165, %169 : vector<16x16xf32>
    %cst_66 = arith.constant dense<0.000000e+00> : vector<16x32xf32>
    %171 = tpu.matmul %170, %22, %cst_66 {dimension_numbers = #tpu.dot_dimension_numbers<[1], [0], [0], [1], [0, 0, 1, 1], [], []>} : vector<16x16xf32>, vector<16x32xf32>, vector<16x32xf32> -> vector<16x32xf32>
    %cst_67 = arith.constant 0.000000e+00 : f32
    %172 = vector.shape_cast %153 : vector<1x32xi1> to vector<1x32xi1>
    %173 = vector.broadcast %172 : vector<1x32xi1> to vector<16x32xi1>
    %174 = vector.broadcast %cst_67 : f32 to vector<16x32xf32>
    %175 = arith.select %173, %171, %174 : vector<16x32xi1>, vector<16x32xf32>
    %176 = arith.addf %148, %175 : vector<16x32xf32>
    %cst_68 = arith.constant dense<0.000000e+00> : vector<16x32xf32>
    %177 = tpu.matmul %176, %6, %cst_68 {dimension_numbers = #tpu.dot_dimension_numbers<[1], [0], [0], [1], [0, 0, 1, 1], [], []>} : vector<16x32xf32>, vector<32x32xf32>, vector<16x32xf32> -> vector<16x32xf32>
    %178 = vector.broadcast %11 : vector<1x32xf32> to vector<16x32xf32>
    %179 = arith.addf %177, %178 : vector<16x32xf32>
    %180 = arith.addf %0, %179 : vector<16x32xf32>
    %cst_69 = arith.constant dense<0.000000e+00> : vector<16xf32>
    %181 = vector.multi_reduction <add>, %180, %cst_69 [1] : vector<16x32xf32> to vector<16xf32>
    %182 = vector.shape_cast %181 : vector<16xf32> to vector<16x1xf32>
    %cst_70 = arith.constant 3.200000e+01 : f32
    %183 = vector.broadcast %cst_70 : f32 to vector<16x1xf32>
    %184 = arith.divf %182, %183 : vector<16x1xf32>
    %185 = vector.broadcast %184 : vector<16x1xf32> to vector<16x32xf32>
    %186 = arith.subf %180, %185 : vector<16x32xf32>
    %187 = arith.mulf %186, %186 : vector<16x32xf32>
    %cst_71 = arith.constant dense<0.000000e+00> : vector<16xf32>
    %188 = vector.multi_reduction <add>, %187, %cst_71 [1] : vector<16x32xf32> to vector<16xf32>
    %189 = vector.shape_cast %188 : vector<16xf32> to vector<16x1xf32>
    %cst_72 = arith.constant 3.200000e+01 : f32
    %190 = vector.broadcast %cst_72 : f32 to vector<16x1xf32>
    %191 = arith.divf %189, %190 : vector<16x1xf32>
    %192 = vector.broadcast %184 : vector<16x1xf32> to vector<16x32xf32>
    %193 = arith.subf %180, %192 : vector<16x32xf32>
    %cst_73 = arith.constant 9.99999974E-6 : f32
    %194 = vector.broadcast %cst_73 : f32 to vector<16x1xf32>
    %195 = arith.addf %191, %194 : vector<16x1xf32>
    %196 = math.rsqrt %195 : vector<16x1xf32>
    %197 = vector.broadcast %196 : vector<16x1xf32> to vector<16x32xf32>
    %198 = arith.mulf %193, %197 : vector<16x32xf32>
    %199 = vector.broadcast %13 : vector<1x32xf32> to vector<16x32xf32>
    %200 = arith.mulf %198, %199 : vector<16x32xf32>
    %201 = vector.broadcast %14 : vector<1x32xf32> to vector<16x32xf32>
    %202 = arith.addf %200, %201 : vector<16x32xf32>
    %cst_74 = arith.constant dense<0.000000e+00> : vector<16x64xf32>
    %203 = tpu.matmul %202, %4, %cst_74 {dimension_numbers = #tpu.dot_dimension_numbers<[1], [0], [0], [1], [0, 0, 1, 1], [], []>} : vector<16x32xf32>, vector<32x64xf32>, vector<16x64xf32> -> vector<16x64xf32>
    %204 = vector.broadcast %9 : vector<1x64xf32> to vector<16x64xf32>
    %205 = arith.addf %203, %204 : vector<16x64xf32>
    %cst_75 = arith.constant 0.000000e+00 : f32
    %206 = vector.broadcast %cst_75 : f32 to vector<16x64xf32>
    %207 = arith.maximumf %205, %206 : vector<16x64xf32>
    %cst_76 = arith.constant dense<0.000000e+00> : vector<16x32xf32>
    %208 = tpu.matmul %207, %7, %cst_76 {dimension_numbers = #tpu.dot_dimension_numbers<[1], [0], [0], [1], [0, 0, 1, 1], [], []>} : vector<16x64xf32>, vector<64x32xf32>, vector<16x32xf32> -> vector<16x32xf32>
    %209 = vector.broadcast %12 : vector<1x32xf32> to vector<16x32xf32>
    %210 = arith.addf %208, %209 : vector<16x32xf32>
    %211 = arith.addf %202, %210 : vector<16x32xf32>
    %cst_77 = arith.constant dense<0.000000e+00> : vector<16xf32>
    %212 = vector.multi_reduction <add>, %211, %cst_77 [1] : vector<16x32xf32> to vector<16xf32>
    %213 = vector.shape_cast %212 : vector<16xf32> to vector<16x1xf32>
    %cst_78 = arith.constant 3.200000e+01 : f32
    %214 = vector.broadcast %cst_78 : f32 to vector<16x1xf32>
    %215 = arith.divf %213, %214 : vector<16x1xf32>
    %216 = vector.broadcast %215 : vector<16x1xf32> to vector<16x32xf32>
    %217 = arith.subf %211, %216 : vector<16x32xf32>
    %218 = arith.mulf %217, %217 : vector<16x32xf32>
    %cst_79 = arith.constant dense<0.000000e+00> : vector<16xf32>
    %219 = vector.multi_reduction <add>, %218, %cst_79 [1] : vector<16x32xf32> to vector<16xf32>
    %220 = vector.shape_cast %219 : vector<16xf32> to vector<16x1xf32>
    %cst_80 = arith.constant 3.200000e+01 : f32
    %221 = vector.broadcast %cst_80 : f32 to vector<16x1xf32>
    %222 = arith.divf %220, %221 : vector<16x1xf32>
    %223 = vector.broadcast %215 : vector<16x1xf32> to vector<16x32xf32>
    %224 = arith.subf %211, %223 : vector<16x32xf32>
    %cst_81 = arith.constant 9.99999974E-6 : f32
    %225 = vector.broadcast %cst_81 : f32 to vector<16x1xf32>
    %226 = arith.addf %222, %225 : vector<16x1xf32>
    %227 = math.rsqrt %226 : vector<16x1xf32>
    %228 = vector.broadcast %227 : vector<16x1xf32> to vector<16x32xf32>
    %229 = arith.mulf %224, %228 : vector<16x32xf32>
    %230 = vector.broadcast %15 : vector<1x32xf32> to vector<16x32xf32>
    %231 = arith.mulf %229, %230 : vector<16x32xf32>
    %232 = vector.broadcast %16 : vector<1x32xf32> to vector<16x32xf32>
    %233 = arith.addf %231, %232 : vector<16x32xf32>
    %c0_82 = arith.constant 0 : index
    %c0_83 = arith.constant 0 : index
    %234 = vector.load %arg6[%c0_82, %c0_83] : memref<16x32xf32, #tpu.memory_space<vmem>>, vector<16x32xf32>
    tpu.vector_store %arg6[%c0_82, %c0_83], %233 {strides = array<i32>} : memref<16x32xf32, #tpu.memory_space<vmem>>, vector<16x32xf32>,
    return
  }
}

</mosaic_0001>

<bundles_post_ra>
// kernel: tpu_custom_call.1
= control target key start
LH: loop header
LB: loop body
LE: loop exit
PB: predicated region body
PF: predicated region fallthrough
CT: control target
= control target key end

     0   :  { %vm67_vm0 = vcmask 261120   ;;  %s2074_s0 = inlined_call_operand.vmem [shape: f32[16,32], index: 0, kind: input, shape index: {}]   ;;  %s2075_s1 = inlined_call_operand.vmem [shape: f32[16,32], index: 1, kind: input, shape index: {}]   ;;  %s2076_s2 = inlined_call_operand.vmem [shape: f32[64,64], index: 2, kind: input, shape index: {}]   ;;  %s2077_s3 = inlined_call_operand.vmem [shape: f32[128,32], index: 3, kind: input, shape index: {}]   ;;  %s2078_s4 = inlined_call_operand.vmem [shape: f32[2,64], index: 4, kind: input, shape index: {}]   ;;  %s2079_s5 = inlined_call_operand.vmem [shape: f32[8,32], index: 5, kind: input, shape index: {}]   ;;  %s2080_s6 = inlined_call_operand.hbm [shape: f32[16,32], index: 6, kind: output, shape index: {}]  }
   0x1   :  { %v33_v0 = vld [vmem:[%s2076_s2 + $0x18] sm:$0xff]  ;;  %v32_v1 = vld [vmem:[%s2076_s2 + $0x10] sm:$0xff]  ;;  %v1777_v2 = vld [vmem:[%s2074_s0] sm:$0xff] }
   0x2   :  { %1540 = vmatprep.subr.mxu1 %v33_v0  ;;  %v26_v3 = vld [vmem:[%s2075_s1] sm:$0xff]  ;;  %v31_v4 = vld [vmem:[%s2076_s2 + $0x8] sm:$0xff] }
   0x3   :  { %1541 = vmatpush3.msra.mxu1 %v33_v0  ;;  %v28_v5 = vadd.f32 %v26_v3, %v1777_v2  ;;  %v1789_v6 = vld [vmem:[%s2074_s0 + $0x8] sm:$0xff]  ;;  %v30_v8 = vld [vmem:[%s2076_s2] sm:$0xff] }
   0x4   :  { %v27_v7 = vld [vmem:[%s2075_s1 + $0x8] sm:$0xff]  ;;  %1542 = vmatprep.subr.mxu1 %v32_v1 }
   0x5   :  { %1543 = vmatpush3.msra.mxu1 %v32_v1  ;;  %1548 = vmatprep.mubr.msk.f32.mxu1 %vm67_vm0, %v28_v5 }
   0x6   :  { %11 = vsyncpa [#allocation3], 0  ;;  %1544 = vmatprep.subr.mxu1 %v31_v4  ;;  %v29_v9 = vadd.f32 %v27_v7, %v1789_v6  ;;  %v41_v10 = vld [vmem:[%s2077_s3 + $0x18] sm:$0xff]  ;;  %v40_v11 = vld [vmem:[%s2077_s3 + $0x10] sm:$0xff]  ;;  %v234_v14 = vlaneseq  ;;  %v1727_v21 = vmov 0.0   ;;  %s1728_s21 = smov 96  }
   0x7   :  { %1545 = vmatpush3.msra.mxu1 %v31_v4  ;;  %v39_v12 = vld [vmem:[%s2077_s3 + $0x8] sm:$0xff]  ;;  %v38_v13 = vld [vmem:[%s2077_s3] sm:$0xff]  ;;  %v1729_v50 = vmov -1e+30   ;;  %vm376_vm13 = vcmask 130048   ;;  %vm1291_vm14 = vcmask 523264  }
   0x8   :  { %1546 = vmatprep.subr.mxu1 %v30_v8  ;;  %v1816_v15 = vand.u32 127, %v234_v14  ;;  %v1431_v18 = vld [vmem:[%s2078_s4] ss:$0 sm:$0xff]  ;;  %v235_v44 = vshrl.u32 %v234_v14, 7  ;;  %s1730_s15 = smov [#allocation2]  }
   0x9   :  { %1547 = vmatpush3.msra.mxu1 %v30_v8  ;;  %v1434_v37 = vld [vmem:[%s2079_s5] ss:$0 sm:$0xff]  ;;  %s1420_s16 = sshll.u32 %s1730_s15, 4  ;;  %s1421_s16 = int_to_ptr.vmem [resolvable:$true] %s1420_s16 }
   0xa   :  { %1549 = vmatmul.mubr.msk.f32.vlgmr.msra.gmra.mxu1 %vm67_vm0, %v29_v9  ;;  %1551 = vmatprep.subr.mxu1 %v41_v10  ;;  %vm486_vm1 = vcmp.ge.s32.totalorder %v1816_v15, 8  ;;  %vm487_vm2 = vcmp.lt.s32.totalorder %v1816_v15, 16  ;;  %vm682_vm3 = vcmp.ge.s32.totalorder %v1816_v15, 16  ;;  %vm683_vm4 = vcmp.lt.s32.totalorder %v1816_v15, 24  ;;  %s1705_s17 = scalar_lea.vmem %s1421_s16, 256  ;;  %p1710_p1 = scmp.lt.s32.totalorder %s1421_s16, %s1421_s16 }
   0xb   :  { %1552 = vmatpush3.msra.mxu1 %v41_v10  ;;  %1559 = vmatprep.mubr.msk.f32.mxu1 %vm67_vm0, %v1777_v2  ;;  %vm878_vm5 = vcmp.ge.s32.totalorder %v1816_v15, 24  ;;  %vm879_vm6 = vcmp.lt.s32.totalorder %v1816_v15, 32  ;;  %vm1824_vm7 = vmand %vm486_vm1, %vm487_vm2  ;;  %vm280_vm8 = vcmp.lt.s32.totalorder %v1816_v15, 8  ;;  %v236_v45 = vadd.s32 8, %v235_v44  ;;  %p1706_p0 = scmp.ne.s32.totalorder %s1421_s16, %s1705_s17  ;;  %p1711_p2 = scmp.lt.s32.totalorder %s1705_s17, %s1705_s17 }
   0xc   :  { %1553 = vmatprep.subr.mxu1 %v40_v11  ;;  %vm1829_vm9 = vmand %vm682_vm3, %vm683_vm4  ;;  %v282_v22 = vsel %vm280_vm8, 0.35355338, %v1727_v21  ;;  %v489_v23 = vsel %vm1824_vm7, 0.35355338, %v1727_v21  ;;  %v243_v46 = vand.u32 1, %v235_v44  ;;  %v267_v48 = vand.u32 1, %v1816_v15 }
   0xd   :  { %1554 = vmatpush3.msra.mxu1 %v40_v11  ;;  %vm1836_vm10 = vmand %vm878_vm5, %vm879_vm6  ;;  %v685_v24 = vsel %vm1829_vm9, 0.35355338, %v1727_v21  ;;  %v250_v47 = vand.u32 1, %v236_v45  ;;  %p1712_p3 = por %p1711_p2, %p1710_p1 }
   0xe   :  { %1555 = vmatprep.subr.mxu1 %v39_v12  ;;  %v881_v26 = vsel %vm1836_vm10, 0.35355338, %v1727_v21  ;;  %vm275_vm11 = vcmp.eq.s32.totalorder %v243_v46, %v267_v48 }
   0xf   :  { %1556 = vmatpush3.msra.mxu1 %v39_v12  ;;  %vm276_vm12 = vcmp.eq.s32.totalorder %v250_v47, %v267_v48  ;;  %v1894_v51 = vsel %vm275_vm11, 0.0, %v1729_v50  ;;  %p1713_p4 = pnand %p1712_p3, %p1706_p0 }
  0x10   :  { %1557 = vmatprep.subr.mxu1 %v38_v13  ;;  %v1896_v52 = vsel %vm276_vm12, 0.0, %v1729_v50 }
  0x11   :  { %1558 = vmatpush3.msra.mxu1 %v38_v13 }
  0x12   :  { %1560 = vmatmul.mubr.msk.f32.vlgmr.msra.gmra.mxu1 %vm67_vm0, %v1789_v6 }
  0xca   :  { %v1550_v20 = vpop.f32.mrf.mxu1 }
  0xcb   :  { %v146_v25 = vadd.f32 %v1550_v20, %v1431_v18 }
  0xcc   :  { %v140_v27 = vpop.f32.mrf.mxu1 }
  0xcd   :  { %v141_v28 = vadd.f32 %v1431_v18, %v140_v27  ;;  %289 = vrot.lane.b32.xlu0 %v146_v25, %s1728_s21  ;;  %v284_v29 = vmul.f32 %v282_v22, %v146_v25  ;;  %v1848_v30 = vmul.f32 %v489_v23, %v146_v25  ;;  %v1850_v31 = vmul.f32 %v685_v24, %v146_v25 }
  0xce   :  { %v1852_v32 = vmul.f32 %v881_v26, %v146_v25 }
  0xcf   :  { %v283_v33 = vmul.f32 %v282_v22, %v141_v28  ;;  %v1854_v34 = vmul.f32 %v489_v23, %v141_v28  ;;  %v1856_v35 = vmul.f32 %v685_v24, %v141_v28  ;;  %v1858_v36 = vmul.f32 %v881_v26, %v141_v28 }
  0xd1   :  { %287 = vrot.lane.b32.xlu0 %v141_v28, %s1728_s21  ;;  %1566 = vmatprep.mubr.msk.f32.mxu0 %vm67_vm0, %v283_v33 }
  0xd2   :  { %v1561_v38 = vpop.f32.mrf.mxu1 }
  0xd3   :  { %v1864_v39 = vadd.f32 %v1561_v38, %v1434_v37 }
  0xd4   :  { %v225_v40 = vpop.f32.mrf.mxu1 }
  0xd5   :  { %v1866_v41 = vadd.f32 %v1434_v37, %v225_v40  ;;  %1569 = vmatprep.subr.mxu1 %v1864_v39 }
  0xd6   :  { %1570 = vmatpush3.msra.mxu1 %v1864_v39 }
  0xd7   :  { %1571 = vmatprep.subr.mxu1 %v1866_v41 }
  0xd8   :  { %1572 = vmatpush3.msra.mxu1 %v1866_v41 }
 0x13f   :  { %v1872_v42 = vpop.permute.xlu0 %289 }
 0x140   :  { %1562 = vmatprep.subr.msk.mxu0 %vm67_vm0, %v1872_v42  ;;  %1576 = vmatprep.subr.msk.mxu1 %vm67_vm0, %v1872_v42 }
 0x141   :  { %1563 = vmatpush3.xpose.msk.msra.mxu0 %vm67_vm0, %v1872_v42 }
 0x143   :  { %v1880_v43 = vpop.permute.xlu0 %287 }
 0x144   :  { %1564 = vmatprep.subr.msk.mxu0 %vm67_vm0, %v1880_v43 }
 0x145   :  { %1565 = vmatpush3.xpose.msk.msra.mxu0 %vm67_vm0, %v1880_v43 }
 0x146   :  { %1583 = vmatprep.subr.mxu0 %v1864_v39 }
 0x148   :  { %1567 = vmatmul.mubr.msk.f32.vlgmr.msra.gmra.mxu0 %vm67_vm0, %v284_v29 }
 0x149   :  { %1584 = vmatpush3.msra.mxu0 %v1864_v39 }
 0x14a   :  { %1585 = vmatprep.subr.mxu0 %v1866_v41 }
 0x14b   :  { %1586 = vmatpush3.msra.mxu0 %v1866_v41 }
 0x14c   :  { %1590 = vmatprep.subr.msk.mxu0 %vm67_vm0, %v1872_v42 }
 0x208   :  { %v1568_v49 = vpop.f32.mrf.mxu0 }
 0x209   :  { %v373_v55 = vadd.f32 %v1568_v49, %v1896_v52 }
 0x20a   :  { %v367_v53 = vpop.f32.mrf.mxu0 }
 0x20b   :  { %v368_v54 = vadd.f32 %v367_v53, %v1894_v51  ;;  %v380_v57 = vsel %vm376_vm13, %v373_v55, -inf }
 0x20d   :  { %v377_v56 = vsel %vm376_vm13, %v368_v54, -inf }
 0x20e   :  { %378 = vmax.xlane.f32.xlu1 %v377_v56 }
 0x212   :  { %381 = vmax.xlane.f32.xlu1 %v380_v57 }
 0x297   :  { %v379_v58 = vpop.xlane.xlu1 %378 }
 0x298   :  { %v383_v59 = vsub.f32 %v368_v54, %v379_v58 }
 0x29a   :  { %v385_v60 = vmul.f32 1.442695, %v383_v59 }
 0x29b   :  { %v382_v61 = vpop.xlane.xlu1 %381 }
 0x29c   :  { %1665 = vpow2.f32 %v385_v60  ;;  %v384_v62 = vsub.f32 %v373_v55, %v382_v61 }
 0x29e   :  { %v387_v63 = vmul.f32 1.442695, %v384_v62 }
 0x2a0   :  { %1667 = vpow2.f32 %v387_v63 }
 0x2a9   :  { %v1666_v0 = vpop.eup %1665 }
 0x2aa   :  { %v389_v1 = vsel %vm376_vm13, %v1666_v0, 0.0 }
 0x2ab   :  { %390 = vadd.xlane.f32.xlu0 %v389_v1 }
 0x2ad   :  { %v1668_v3 = vpop.eup %1667 }
 0x2ae   :  { %v392_v4 = vsel %vm376_vm13, %v1668_v3, 0.0 }
 0x2af   :  { %393 = vadd.xlane.f32.xlu1 %v392_v4 }
 0x334   :  { %v391_v5 = vpop.xlane.xlu0 %390 }
 0x335   :  { %1669 = vrcp.f32 %v391_v5 }
 0x338   :  { %v394_v7 = vpop.xlane.xlu1 %393 }
 0x339   :  { %1671 = vrcp.f32 %v394_v7 }
 0x342   :  { %v1670_v8 = vpop.eup %1669 }
 0x343   :  { %v397_v9 = vmul.f32 %v1670_v8, %v1666_v0 }
 0x345   :  { %1573 = vmatprep.mubr.msk.f32.mxu1 %vm376_vm13, %v397_v9 }
 0x346   :  { %v1672_v10 = vpop.eup %1671 }
 0x347   :  { %v398_v11 = vmul.f32 %v1672_v10, %v1668_v3 }
 0x349   :  { %1574 = vmatmul.mubr.msk.f32.vlgmr.msra.gmra.mxu1 %vm376_vm13, %v398_v11 }
 0x34a   :  { %1577 = vmatpush3.xpose.msk.msra.mxu1 %vm67_vm0, %v1872_v42  ;;  %1580 = vmatprep.mubr.msk.f32.mxu1 %vm67_vm0, %v1854_v34 }
 0x34b   :  { %1578 = vmatprep.subr.msk.mxu1 %vm67_vm0, %v1880_v43 }
 0x34e   :  { %1579 = vmatpush3.xpose.msk.msra.mxu1 %vm67_vm0, %v1880_v43 }
 0x34f   :  { %1597 = vmatprep.subr.mxu1 %v1864_v39 }
 0x351   :  { %1581 = vmatmul.mubr.msk.f32.vlgmr.msra.gmra.mxu1 %vm67_vm0, %v1848_v30 }
 0x352   :  { %1598 = vmatpush3.msra.mxu1 %v1864_v39 }
 0x353   :  { %1599 = vmatprep.subr.mxu1 %v1866_v41 }
 0x354   :  { %1600 = vmatpush3.msra.mxu1 %v1866_v41 }
 0x355   :  { %1604 = vmatprep.subr.msk.mxu1 %vm67_vm0, %v1872_v42 }
 0x409   :  { %v1575_v12 = vpop.f32.mrf.mxu1 }
 0x40b   :  { %v471_v13 = vpop.f32.mrf.mxu1 }
 0x40c   :  { %v482_v54 = vsel %vm280_vm8, %v471_v13, 0.0 }
 0x411   :  { %v1582_v14 = vpop.f32.mrf.mxu1 }
 0x412   :  { %v570_v21 = vadd.f32 %v1582_v14, %v1896_v52 }
 0x413   :  { %v564_v18 = vpop.f32.mrf.mxu1 }
 0x414   :  { %v565_v20 = vadd.f32 %v564_v18, %v1894_v51  ;;  %v576_v23 = vsel %vm376_vm13, %v570_v21, -inf }
 0x416   :  { %v573_v22 = vsel %vm376_vm13, %v565_v20, -inf }
 0x417   :  { %574 = vmax.xlane.f32.xlu1 %v573_v22 }
 0x41b   :  { %577 = vmax.xlane.f32.xlu1 %v576_v23 }
 0x4a0   :  { %v575_v24 = vpop.xlane.xlu1 %574 }
 0x4a1   :  { %v579_v25 = vsub.f32 %v565_v20, %v575_v24 }
 0x4a3   :  { %v581_v26 = vmul.f32 1.442695, %v579_v25 }
 0x4a4   :  { %v578_v27 = vpop.xlane.xlu1 %577 }
 0x4a5   :  { %1673 = vpow2.f32 %v581_v26  ;;  %v580_v28 = vsub.f32 %v570_v21, %v578_v27 }
 0x4a7   :  { %v583_v29 = vmul.f32 1.442695, %v580_v28 }
 0x4a9   :  { %1675 = vpow2.f32 %v583_v29 }
 0x4b2   :  { %v1674_v30 = vpop.eup %1673 }
 0x4b3   :  { %v585_v33 = vsel %vm376_vm13, %v1674_v30, 0.0 }
 0x4b4   :  { %586 = vadd.xlane.f32.xlu1 %v585_v33  ;;  %v45_v33 = vld [vmem:[%s2077_s3 + $0x38] sm:$0xff] }
 0x4b6   :  { %v1676_v34 = vpop.eup %1675 }
 0x4b7   :  { %v588_v37 = vsel %vm376_vm13, %v1676_v34, 0.0 }
 0x4b8   :  { %589 = vadd.xlane.f32.xlu1 %v588_v37 }
 0x53d   :  { %v587_v38 = vpop.xlane.xlu1 %586 }
 0x53e   :  { %1677 = vrcp.f32 %v587_v38 }
 0x541   :  { %v590_v40 = vpop.xlane.xlu1 %589 }
 0x542   :  { %1679 = vrcp.f32 %v590_v40 }
 0x54b   :  { %v1678_v44 = vpop.eup %1677 }
 0x54c   :  { %v593_v45 = vmul.f32 %v1678_v44, %v1674_v30 }
 0x54e   :  { %1587 = vmatprep.mubr.msk.f32.mxu0 %vm376_vm13, %v593_v45 }
 0x54f   :  { %v1680_v46 = vpop.eup %1679 }
 0x550   :  { %v594_v47 = vmul.f32 %v1680_v46, %v1676_v34  ;;  %v44_v46 = vld [vmem:[%s2077_s3 + $0x30] sm:$0xff] }
 0x552   :  { %1588 = vmatmul.mubr.msk.f32.vlgmr.msra.gmra.mxu0 %vm376_vm13, %v594_v47  ;;  %v43_v47 = vld [vmem:[%s2077_s3 + $0x28] sm:$0xff] }
 0x553   :  { %1591 = vmatpush3.xpose.msk.msra.mxu0 %vm67_vm0, %v1872_v42  ;;  %1594 = vmatprep.mubr.msk.f32.mxu0 %vm67_vm0, %v1856_v35  ;;  %v483_v35 = vsel %vm280_vm8, %v1575_v12, 0.0 }
 0x554   :  { %1592 = vmatprep.subr.msk.mxu0 %vm67_vm0, %v1880_v43 }
 0x557   :  { %1593 = vmatpush3.xpose.msk.msra.mxu0 %vm67_vm0, %v1880_v43 }
 0x558   :  { %1611 = vmatprep.subr.mxu0 %v1864_v39 }
 0x55a   :  { %1595 = vmatmul.mubr.msk.f32.vlgmr.msra.gmra.mxu0 %vm67_vm0, %v1850_v31 }
 0x55b   :  { %1612 = vmatpush3.msra.mxu0 %v1864_v39 }
 0x55c   :  { %1613 = vmatprep.subr.mxu0 %v1866_v41 }
 0x55d   :  { %1614 = vmatpush3.msra.mxu0 %v1866_v41 }
 0x55e   :  { %1618 = vmatprep.subr.mxu0 %v45_v33 }
 0x612   :  { %v1589_v48 = vpop.f32.mrf.mxu0 }
 0x613   :  { %v679_v49 = vsel %vm1824_vm7, %v1589_v48, 0.0  ;;  %v42_v48 = vld [vmem:[%s2077_s3 + $0x20] sm:$0xff] }
 0x614   :  { %v681_v50 = vadd.f32 %v679_v49, %v483_v35  ;;  %v667_v53 = vpop.f32.mrf.mxu0 }
 0x615   :  { %v678_v31 = vsel %vm1824_vm7, %v667_v53, 0.0 }
 0x616   :  { %v680_v39 = vadd.f32 %v678_v31, %v482_v54 }
 0x61a   :  { %v1596_v55 = vpop.f32.mrf.mxu0 }
 0x61b   :  { %v766_v57 = vadd.f32 %v1596_v55, %v1896_v52 }
 0x61c   :  { %v760_v56 = vpop.f32.mrf.mxu0 }
 0x61d   :  { %v761_v41 = vadd.f32 %v760_v56, %v1894_v51  ;;  %v772_v59 = vsel %vm376_vm13, %v766_v57, -inf }
 0x61f   :  { %v769_v58 = vsel %vm376_vm13, %v761_v41, -inf }
 0x620   :  { %770 = vmax.xlane.f32.xlu1 %v769_v58 }
 0x624   :  { %773 = vmax.xlane.f32.xlu1 %v772_v59 }
 0x6a9   :  { %v771_v60 = vpop.xlane.xlu1 %770 }
 0x6aa   :  { %v775_v61 = vsub.f32 %v761_v41, %v771_v60 }
 0x6ac   :  { %v777_v15 = vmul.f32 1.442695, %v775_v61 }
 0x6ad   :  { %v774_v62 = vpop.xlane.xlu1 %773 }
 0x6ae   :  { %1681 = vpow2.f32 %v777_v15  ;;  %v776_v16 = vsub.f32 %v766_v57, %v774_v62 }
 0x6b0   :  { %v779_v63 = vmul.f32 1.442695, %v776_v16 }
 0x6b2   :  { %1683 = vpow2.f32 %v779_v63 }
 0x6bb   :  { %v1682_v0 = vpop.eup %1681 }
 0x6bc   :  { %v781_v1 = vsel %vm376_vm13, %v1682_v0, 0.0 }
 0x6bd   :  { %782 = vadd.xlane.f32.xlu1 %v781_v1 }
 0x6bf   :  { %v1684_v3 = vpop.eup %1683 }
 0x6c0   :  { %v784_v4 = vsel %vm376_vm13, %v1684_v3, 0.0 }
 0x6c1   :  { %785 = vadd.xlane.f32.xlu0 %v784_v4 }
 0x746   :  { %v783_v5 = vpop.xlane.xlu1 %782 }
 0x747   :  { %1685 = vrcp.f32 %v783_v5  ;;  %v36_v5 = vld [vmem:[%s2076_s2 + $0x30] sm:$0xff] }
 0x74a   :  { %v786_v7 = vpop.xlane.xlu0 %785 }
 0x74b   :  { %1687 = vrcp.f32 %v786_v7  ;;  %v35_v7 = vld [vmem:[%s2076_s2 + $0x28] sm:$0xff] }
 0x754   :  { %v1686_v8 = vpop.eup %1685 }
 0x755   :  { %v789_v9 = vmul.f32 %v1686_v8, %v1682_v0  ;;  %v34_v8 = vld [vmem:[%s2076_s2 + $0x20] sm:$0xff] }
 0x757   :  { %1601 = vmatprep.mubr.msk.f32.mxu1 %vm376_vm13, %v789_v9  ;;  %v53_v9 = vld [vmem:[%s2077_s3 + $0x78] sm:$0xff] }
 0x758   :  { %v1688_v10 = vpop.eup %1687 }
 0x759   :  { %v790_v11 = vmul.f32 %v1688_v10, %v1684_v3  ;;  %v52_v10 = vld [vmem:[%s2077_s3 + $0x70] sm:$0xff] }
 0x75b   :  { %1602 = vmatmul.mubr.msk.f32.vlgmr.msra.gmra.mxu1 %vm376_vm13, %v790_v11  ;;  %v51_v11 = vld [vmem:[%s2077_s3 + $0x68] sm:$0xff] }
 0x75c   :  { %1605 = vmatpush3.xpose.msk.msra.mxu1 %vm67_vm0, %v1872_v42  ;;  %1608 = vmatprep.mubr.msk.f32.mxu1 %vm67_vm0, %v1858_v36 }
 0x75d   :  { %1606 = vmatprep.subr.msk.mxu1 %vm67_vm0, %v1880_v43 }
 0x760   :  { %1607 = vmatpush3.xpose.msk.msra.mxu1 %vm67_vm0, %v1880_v43 }
 0x763   :  { %1609 = vmatmul.mubr.msk.f32.vlgmr.msra.gmra.mxu1 %vm67_vm0, %v1852_v32 }
 0x81b   :  { %v1603_v12 = vpop.f32.mrf.mxu1 }
 0x81c   :  { %v875_v13 = vsel %vm1829_vm9, %v1603_v12, 0.0  ;;  %v50_v12 = vld [vmem:[%s2077_s3 + $0x60] sm:$0xff] }
 0x81d   :  { %v877_v14 = vadd.f32 %v875_v13, %v681_v50  ;;  %v863_v18 = vpop.f32.mrf.mxu1 }
 0x81e   :  { %v874_v42 = vsel %vm1829_vm9, %v863_v18, 0.0 }
 0x81f   :  { %v876_v20 = vadd.f32 %v874_v42, %v680_v39  ;;  %v1461_v39 = vld [vmem:[%s2079_s5 + $0x1] ss:$0 sm:$0xff] }
 0x823   :  { %v1610_v36 = vpop.f32.mrf.mxu1 }
 0x824   :  { %v962_v21 = vadd.f32 %v1610_v36, %v1896_v52 }
 0x825   :  { %v956_v22 = vpop.f32.mrf.mxu1 }
 0x826   :  { %v957_v23 = vadd.f32 %v956_v22, %v1894_v51  ;;  %v968_v43 = vsel %vm376_vm13, %v962_v21, -inf  ;;  %v1464_v22 = vld [vmem:[%s2079_s5 + $0x3] ss:$0 sm:$0xff] }
 0x827   :  { %969 = vmax.xlane.f32.xlu0 %v968_v43 }
 0x828   :  { %v965_v32 = vsel %vm376_vm13, %v957_v23, -inf }
 0x829   :  { %966 = vmax.xlane.f32.xlu1 %v965_v32 }
 0x8b0   :  { %v970_v24 = vpop.xlane.xlu0 %969 }
 0x8b1   :  { %v972_v25 = vsub.f32 %v962_v21, %v970_v24 }
 0x8b2   :  { %v967_v26 = vpop.xlane.xlu1 %966 }
 0x8b3   :  { %v975_v27 = vmul.f32 1.442695, %v972_v25  ;;  %v971_v28 = vsub.f32 %v957_v23, %v967_v26  ;;  %v1465_v25 = vld [vmem:[%s2079_s5 + $0x4] ss:$0 sm:$0xff] }
 0x8b5   :  { %1689 = vpow2.f32 %v975_v27  ;;  %v973_v17 = vmul.f32 1.442695, %v971_v28 }
 0x8b7   :  { %1691 = vpow2.f32 %v973_v17  ;;  %v49_v17 = vld [vmem:[%s2077_s3 + $0x58] sm:$0xff] }
 0x8c2   :  { %v1690_v29 = vpop.eup %1689 }
 0x8c3   :  { %v980_v52 = vsel %vm376_vm13, %v1690_v29, 0.0 }
 0x8c4   :  { %v1692_v30 = vpop.eup %1691  ;;  %981 = vadd.xlane.f32.xlu0 %v980_v52  ;;  %v47_v52 = vld [vmem:[%s2077_s3 + $0x48] sm:$0xff] }
 0x8c5   :  { %v977_v51 = vsel %vm376_vm13, %v1692_v30, 0.0 }
 0x8c6   :  { %978 = vadd.xlane.f32.xlu1 %v977_v51  ;;  %v1466_v51 = vld [vmem:[%s2078_s4 + $0x1] ss:$0 sm:$0xff] }
 0x94d   :  { %v982_v34 = vpop.xlane.xlu0 %981 }
 0x94e   :  { %1693 = vrcp.f32 %v982_v34 }
 0x94f   :  { %v979_v37 = vpop.xlane.xlu1 %978 }
 0x950   :  { %1695 = vrcp.f32 %v979_v37 }
 0x95b   :  { %v1694_v38 = vpop.eup %1693 }
 0x95c   :  { %v986_v45 = vmul.f32 %v1694_v38, %v1690_v29  ;;  %v48_v29 = vld [vmem:[%s2077_s3 + $0x50] sm:$0xff] }
 0x95d   :  { %v1696_v40 = vpop.eup %1695 }
 0x95e   :  { %v985_v44 = vmul.f32 %v1696_v40, %v1692_v30  ;;  %v46_v30 = vld [vmem:[%s2077_s3 + $0x40] sm:$0xff] }
 0x960   :  { %1615 = vmatprep.mubr.msk.f32.mxu0 %vm376_vm13, %v985_v44 }
 0x961   :  { %1616 = vmatmul.mubr.msk.f32.vlgmr.msra.gmra.mxu0 %vm376_vm13, %v986_v45  ;;  %v1469_v45 = vld [vmem:[%s2079_s5 + $0x2] ss:$0 sm:$0xff] }
 0x962   :  { %1619 = vmatpush3.msra.mxu0 %v45_v33 }
 0x963   :  { %1620 = vmatprep.subr.mxu0 %v44_v46 }
 0x964   :  { %1621 = vmatpush3.msra.mxu0 %v44_v46 }
 0x965   :  { %1622 = vmatprep.subr.mxu0 %v43_v47 }
 0x966   :  { %1623 = vmatpush3.msra.mxu0 %v43_v47 }
 0x967   :  { %1624 = vmatprep.subr.mxu0 %v42_v48 }
 0x968   :  { %1625 = vmatpush3.msra.mxu0 %v42_v48 }
 0x969   :  { %1640 = vmatprep.subr.mxu0 %v53_v9 }
 0xa21   :  { %v1617_v35 = vpop.f32.mrf.mxu0 }
 0xa22   :  { %v1071_v49 = vsel %vm1836_vm10, %v1617_v35, 0.0 }
 0xa23   :  { %v1059_v50 = vpop.f32.mrf.mxu0  ;;  %v1073_v31 = vadd.f32 %v1071_v49, %v877_v14 }
 0xa24   :  { %v1070_v53 = vsel %vm1836_vm10, %v1059_v50, 0.0 }
 0xa25   :  { %v1072_v54 = vadd.f32 %v1070_v53, %v876_v20 }
 0xa27   :  { %1626 = vmatprep.mubr.msk.f32.mxu0 %vm67_vm0, %v1072_v54 }
 0xa28   :  { %1627 = vmatmul.mubr.msk.f32.vlgmr.msra.gmra.mxu0 %vm67_vm0, %v1073_v31 }
 0xa29   :  { %1641 = vmatpush3.msra.mxu0 %v53_v9 }
 0xa2a   :  { %1642 = vmatprep.subr.mxu0 %v52_v10 }
 0xa2b   :  { %1643 = vmatpush3.msra.mxu0 %v52_v10 }
 0xa2c   :  { %1644 = vmatprep.subr.mxu0 %v51_v11 }
 0xa2d   :  { %1645 = vmatpush3.msra.mxu0 %v51_v11 }
 0xa2e   :  { %1646 = vmatprep.subr.mxu0 %v50_v12 }
 0xa2f   :  { %1647 = vmatpush3.msra.mxu0 %v50_v12 }
 0xa30   :  { %1648 = vmatprep.subr.mxu0 %v49_v17 }
 0xa31   :  { %1649 = vmatpush3.msra.mxu0 %v49_v17 }
 0xa32   :  { %1650 = vmatprep.subr.mxu0 %v48_v29 }
 0xa33   :  { %1651 = vmatpush3.msra.mxu0 %v48_v29 }
 0xa34   :  { %1652 = vmatprep.subr.mxu0 %v47_v52 }
 0xa35   :  { %1653 = vmatpush3.msra.mxu0 %v47_v52 }
 0xa36   :  { %1654 = vmatprep.subr.mxu0 %v46_v30 }
 0xa37   :  { %1655 = vmatpush3.msra.mxu0 %v46_v30 }
 0xae8   :  { %v1628_v55 = vpop.f32.mrf.mxu0 }
 0xae9   :  { %v1156_v56 = vadd.f32 %v1628_v55, %v1461_v39 }
 0xaea   :  { %v1150_v41 = vpop.f32.mrf.mxu0 }
 0xaeb   :  { %v1151_v57 = vadd.f32 %v1461_v39, %v1150_v41  ;;  %v1160_v58 = vadd.f32 %v1156_v56, %v1789_v6 }
 0xaed   :  { %v1164_v59 = vsel %vm67_vm0, %v1160_v58, 0.0  ;;  %v1159_v19 = vadd.f32 %v1151_v57, %v1777_v2  ;;  %v37_v2 = vld [vmem:[%s2076_s2 + $0x38] sm:$0xff] }
 0xaee   :  { %1165 = vadd.xlane.f32.xlu0 %v1164_v59  ;;  %1629 = vmatprep.subr.mxu1 %v37_v2 }
 0xaef   :  { %v1161_v60 = vsel %vm67_vm0, %v1159_v19, 0.0  ;;  %1630 = vmatpush3.msra.mxu1 %v37_v2  ;;  %v1473_v2 = vld [vmem:[%s2079_s5 + $0x6] ss:$0 sm:$0xff] }
 0xaf0   :  { %1162 = vadd.xlane.f32.xlu1 %v1161_v60  ;;  %1631 = vmatprep.subr.mxu1 %v36_v5 }
 0xaf1   :  { %1632 = vmatpush3.msra.mxu1 %v36_v5 }
 0xaf2   :  { %1633 = vmatprep.subr.mxu1 %v35_v7 }
 0xaf3   :  { %1634 = vmatpush3.msra.mxu1 %v35_v7 }
 0xaf4   :  { %1635 = vmatprep.subr.mxu1 %v34_v8 }
 0xaf5   :  { %1636 = vmatpush3.msra.mxu1 %v34_v8 }
 0xb77   :  { %v1166_v61 = vpop.xlane.xlu0 %1165 }
 0xb78   :  { %v1169_v15 = vmul.f32 0.03125, %v1166_v61 }
 0xb79   :  { %v1163_v62 = vpop.xlane.xlu1 %1162 }
 0xb7a   :  { %v1171_v16 = vsub.f32 %v1160_v58, %v1169_v15  ;;  %v1168_v63 = vmul.f32 0.03125, %v1163_v62 }
 0xb7c   :  { %v1170_v0 = vsub.f32 %v1159_v19, %v1168_v63  ;;  %v1173_v1 = vmul.f32 %v1171_v16, %v1171_v16 }
 0xb7e   :  { %v1177_v3 = vsel %vm67_vm0, %v1173_v1, 0.0  ;;  %v1172_v4 = vmul.f32 %v1170_v0, %v1170_v0 }
 0xb7f   :  { %1178 = vadd.xlane.f32.xlu0 %v1177_v3  ;;  %v1472_v3 = vld [vmem:[%s2079_s5 + $0x5] ss:$0 sm:$0xff] }
 0xb80   :  { %v1174_v6 = vsel %vm67_vm0, %v1172_v4, 0.0 }
 0xb81   :  { %1175 = vadd.xlane.f32.xlu1 %v1174_v6 }
 0xc08   :  { %v1179_v13 = vpop.xlane.xlu0 %1178 }
 0xc09   :  { %v1181_v14 = vmul.f32 0.03125, %v1179_v13 }
 0xc0a   :  { %v1176_v18 = vpop.xlane.xlu1 %1175 }
 0xc0b   :  { %v1183_v42 = vadd.f32 1e-05, %v1181_v14  ;;  %v1180_v20 = vmul.f32 0.03125, %v1176_v18 }
 0xc0d   :  { %1697 = vrsqrt.f32 %v1183_v42  ;;  %v1182_v36 = vadd.f32 1e-05, %v1180_v20 }
 0xc0f   :  { %1699 = vrsqrt.f32 %v1182_v36 }
 0xc1a   :  { %v1698_v21 = vpop.eup %1697 }
 0xc1b   :  { %v1187_v23 = vmul.f32 %v1698_v21, %v1171_v16 }
 0xc1c   :  { %v1700_v43 = vpop.eup %1699 }
 0xc1d   :  { %v1186_v32 = vmul.f32 %v1700_v43, %v1170_v0  ;;  %v1193_v24 = vmul.f32 %v1464_v22, %v1187_v23 }
 0xc1f   :  { %v1192_v26 = vmul.f32 %v1464_v22, %v1186_v32  ;;  %v1199_v28 = vadd.f32 %v1465_v25, %v1193_v24 }
 0xc21   :  { %v1198_v27 = vadd.f32 %v1465_v25, %v1192_v26 }
 0xc23   :  { %1637 = vmatprep.mubr.msk.f32.mxu1 %vm67_vm0, %v1198_v27 }
 0xc24   :  { %1638 = vmatmul.mubr.msk.f32.vlgmr.msra.gmra.mxu1 %vm67_vm0, %v1199_v28 }
 0xce4   :  { %v1639_v33 = vpop.f32.mrf.mxu1 }
 0xce5   :  { %v1282_v34 = vadd.f32 %v1639_v33, %v1466_v51 }
 0xce6   :  { %v1276_v37 = vpop.f32.mrf.mxu1 }
 0xce7   :  { %v1277_v38 = vadd.f32 %v1466_v51, %v1276_v37  ;;  %v1286_v44 = vmax.f32 %v1282_v34, 0.0 }
 0xce9   :  { %v1285_v40 = vmax.f32 %v1277_v38, 0.0 }
 0xceb   :  { %1656 = vmatprep.mubr.msk.f32.mxu0 %vm1291_vm14, %v1285_v40 }
 0xcec   :  { %1657 = vmatmul.mubr.msk.f32.vlgmr.msra.gmra.mxu0 %vm1291_vm14, %v1286_v44 }
 0xdac   :  { %v1658_v46 = vpop.f32.mrf.mxu0 }
 0xdad   :  { %v1370_v47 = vadd.f32 %v1658_v46, %v1469_v45 }
 0xdae   :  { %v1364_v48 = vpop.f32.mrf.mxu0 }
 0xdaf   :  { %v1365_v35 = vadd.f32 %v1469_v45, %v1364_v48  ;;  %v1374_v49 = vadd.f32 %v1370_v47, %v1199_v28 }
 0xdb1   :  { %v1378_v50 = vsel %vm67_vm0, %v1374_v49, 0.0  ;;  %v1373_v53 = vadd.f32 %v1365_v35, %v1198_v27 }
 0xdb2   :  { %1379 = vadd.xlane.f32.xlu0 %v1378_v50 }
 0xdb3   :  { %v1375_v54 = vsel %vm67_vm0, %v1373_v53, 0.0 }
 0xdb4   :  { %1376 = vadd.xlane.f32.xlu1 %v1375_v54 }
 0xe3b   :  { %v1380_v31 = vpop.xlane.xlu0 %1379 }
 0xe3c   :  { %v1382_v39 = vmul.f32 0.03125, %v1380_v31 }
 0xe3d   :  { %v1377_v55 = vpop.xlane.xlu1 %1376 }
 0xe3e   :  { %v1384_v56 = vsub.f32 %v1374_v49, %v1382_v39  ;;  %v1381_v41 = vmul.f32 0.03125, %v1377_v55 }
 0xe40   :  { %v1383_v57 = vsub.f32 %v1373_v53, %v1381_v41  ;;  %v1386_v58 = vmul.f32 %v1384_v56, %v1384_v56 }
 0xe42   :  { %v1390_v59 = vsel %vm67_vm0, %v1386_v58, 0.0  ;;  %v1385_v19 = vmul.f32 %v1383_v57, %v1383_v57 }
 0xe43   :  { %1391 = vadd.xlane.f32.xlu0 %v1390_v59 }
 0xe44   :  { %v1387_v60 = vsel %vm67_vm0, %v1385_v19, 0.0 }
 0xe45   :  { %1388 = vadd.xlane.f32.xlu1 %v1387_v60 }
 0xecc   :  { %v1392_v61 = vpop.xlane.xlu0 %1391 }
 0xecd   :  { %v1394_v15 = vmul.f32 0.03125, %v1392_v61 }
 0xece   :  { %v1389_v62 = vpop.xlane.xlu1 %1388 }
 0xecf   :  { %v1396_v16 = vadd.f32 1e-05, %v1394_v15  ;;  %v1393_v63 = vmul.f32 0.03125, %v1389_v62 }
 0xed1   :  { %1701 = vrsqrt.f32 %v1396_v16  ;;  %v1395_v0 = vadd.f32 1e-05, %v1393_v63 }
 0xed3   :  { %1703 = vrsqrt.f32 %v1395_v0 }
 0xede   :  { %v1702_v1 = vpop.eup %1701 }
 0xedf   :  { %v1400_v4 = vmul.f32 %v1702_v1, %v1384_v56 }
 0xee0   :  { %v1704_v6 = vpop.eup %1703 }
 0xee1   :  { %v1399_v5 = vmul.f32 %v1704_v6, %v1383_v57  ;;  %v1406_v7 = vmul.f32 %v1472_v3, %v1400_v4 }
 0xee3   :  { %v1405_v8 = vmul.f32 %v1472_v3, %v1399_v5  ;;  %v1412_v9 = vadd.f32 %v1473_v2, %v1406_v7 }
 0xee5   :  { %v1411_v10 = vadd.f32 %v1473_v2, %v1405_v8  ;;  %1414 = vst.msk [vmem:[#allocation2 + $0x8] sm:$0xff] %vm67_vm0, %v1412_v9 }
 0xee7   :  { %1413 = vst.msk [vmem:[#allocation2] sm:$0xff] %vm67_vm0, %v1411_v10 }
 0xee8   :  { %1716 = shalt.err (!%p1713_p4)
}
 0xee9   :  { %s1731_s5 = smov 128   ;;  %s1732_s18 = smov 8  }
 0xeea   :  { %1426 = dma.vmem_to_hbm [thread:$0]  %s1421_s16, 256, %s2080_s6, [#allocation3], %s1731_s5, %s1731_s5, %s1732_s18  }
 0xeeb   :  { %1725 = dma.done.wait [#allocation3], 256  }
 0xeec   :  { %1726 = vsyncadd [#allocation3], 4294967040 }
 0xeed   :  { %1430 = vsyncpa [#allocation3], 1 }

</bundles_post_ra>
